<compile_context>
chip_gen: v6e
topology: v6e:2x2x1
jax: 0.10.0
libtpu: 0.0.40
codegen_flags: <defaults>
</compile_context>

<pallas_src>
import functools

import jax
import jax.numpy as jnp
from jax.experimental import pallas as pl
from jax.experimental.pallas import tpu as pltpu


def _round_up(x: int, m: int) -> int:
    return ((x + m - 1) // m) * m


def _choose_tm(seq: int, block_rows: int) -> int:
    """Row-tile size: multiple of 16 (bf16 sublane granule), big enough to
    amortize ~0.35us/grid-step, small enough to keep >=2 grid steps for v7x
    megacore sharding.  For tiny seq, use a full-extent block (always legal)."""
    if seq <= 16:
        return seq
    tm = min(_round_up(block_rows, 16), _round_up(seq, 16))
    if pl.cdiv(seq, tm) < 2:  # guarantee >= 2 steps so both v7x TCs get work
        tm = max(16, _round_up(pl.cdiv(seq, 2), 16))
    return tm


def ffn_kernel(x_ref, w1_ref, b1_ref, w2_ref, b2_ref, o_ref):
    # Cast streamed f32 x to bf16 in-kernel (hidden under DMA, avoids a
    # separate XLA pad/cast pre-pass over x in HBM).
    x = x_ref[...].astype(jnp.bfloat16)
    # hidden = relu(x @ W1 + b1): bf16 MXU operands, f32 accumulation.
    h = jnp.dot(x, w1_ref[...], preferred_element_type=jnp.float32)
    # Bias + ReLU in f32 on the VPU (v5e has no bf16 VPU).
    h = jnp.maximum(h + b1_ref[...], 0.0)
    # out = hidden @ W2 + b2: downcast activations to bf16 for the MXU, f32 acc.
    y = jnp.dot(h.astype(jnp.bfloat16), w2_ref[...],
                preferred_element_type=jnp.float32)
    o_ref[...] = (y + b2_ref[...]).astype(o_ref.dtype)


@functools.partial(jax.jit, static_argnames=("block_rows",))
def feedforward_pallas(x, w1, b1, w2, b2, *, block_rows: int = 512):
    """x: (seq, input_size) f32.  w1/w2: bf16 (in,out)-layout, b1/b2: f32 (1,out).
    Returns (seq, 1, num_classes) f32, matching the PyTorch module."""
    seq, in_features = x.shape
    h2 = w1.shape[1]
    num_classes = w2.shape[1]

    tm = _choose_tm(seq, block_rows)
    grid = (pl.cdiv(seq, tm),)

    # Rough VMEM budget: double-buffered x/out tiles + (double-buffered but
    # copied-once) resident weights.  Generous headroom; capped at v7x's 64 MiB.
    vmem_need = (2 * (tm * in_features * 4 + tm * num_classes * 4)
                 + 2 * (in_features * h2 * 2 + h2 * 4
                        + h2 * num_classes * 2 + num_classes * 4))
    vmem_limit = int(min(max(4 * vmem_need, 32 * 1024 * 1024), 64 * 1024 * 1024))

    flops = 2 * seq * (in_features * h2 + h2 * num_classes)
    bytes_accessed = (seq * in_features * 4            # x (f32, streamed)
                      + in_features * h2 * 2 + h2 * 4  # W1 (bf16) + b1 (f32)
                      + h2 * num_classes * 2 + num_classes * 4  # W2 + b2
                      + seq * num_classes * 4)         # out (f32, unpadded)

    out2d = pl.pallas_call(
        ffn_kernel,
        out_shape=jax.ShapeDtypeStruct((seq, num_classes), jnp.float32),
        grid=grid,
        in_specs=[
            pl.BlockSpec((tm, in_features), lambda i: (i, 0)),        # x tile (streamed)
            pl.BlockSpec((in_features, h2), lambda i: (0, 0)),        # W1 (VMEM-resident)
            pl.BlockSpec((1, h2), lambda i: (0, 0)),                  # b1 (resident)
            pl.BlockSpec((h2, num_classes), lambda i: (0, 0)),        # W2 (resident)
            pl.BlockSpec((1, num_classes), lambda i: (0, 0)),         # b2 (resident)
        ],
        out_specs=pl.BlockSpec((tm, num_classes), lambda i: (i, 0)),  # real bytes only
        compiler_params=pltpu.CompilerParams(
            dimension_semantics=("parallel",),   # megacore sharding on v7x
            vmem_limit_bytes=vmem_limit,         # v5e default (~16 MiB) too small
        ),
        cost_estimate=pl.CostEstimate(
            flops=flops, transcendentals=0, bytes_accessed=bytes_accessed),
    )(x, w1, b1, w2, b2)

    return out2d.reshape(seq, 1, num_classes)


def init_params(key, input_size, hidden_size, num_classes):
    """Mirror torch.nn.Linear default init (U[-1/sqrt(in), 1/sqrt(in)]), f32."""
    k1, k2, k3, k4 = jax.random.split(key, 4)
    h2 = hidden_size * 2
    bound1 = 1.0 / jnp.sqrt(jnp.float32(hidden_size))  # fc1: Linear(hidden, 2*hidden)
    bound2 = 1.0 / jnp.sqrt(jnp.float32(h2))           # output: Linear(2*hidden, classes)
    # stored transposed: (in_features, out_features)
    w1 = jax.random.uniform(k1, (hidden_size, h2), jnp.float32, -bound1, bound1)
    b1 = jax.random.uniform(k2, (1, h2), jnp.float32, -bound1, bound1)
    w2 = jax.random.uniform(k3, (h2, num_classes), jnp.float32, -bound2, bound2)
    b2 = jax.random.uniform(k4, (1, num_classes), jnp.float32, -bound2, bound2)
    return w1, b1, w2, b2


def pack_params(w1, b1, w2, b2):
    """One-time weight prep (hoisted out of the per-call path): bf16 matmul
    weights, f32 row-vector biases."""
    return (w1.astype(jnp.bfloat16),
            b1.astype(jnp.float32).reshape(1, -1),
            w2.astype(jnp.bfloat16),
            b2.astype(jnp.float32).reshape(1, -1))


def feedforward_ref(x, w1, b1, w2, b2):
    """Pure-JAX reference of the observable forward, same bf16/f32 mixed path."""
    xb = x.astype(jnp.bfloat16)
    h = jnp.maximum(
        jnp.dot(xb, w1.astype(jnp.bfloat16), preferred_element_type=jnp.float32)
        + b1.astype(jnp.float32).reshape(1, -1), 0.0)
    y = (jnp.dot(h.astype(jnp.bfloat16), w2.astype(jnp.bfloat16),
                 preferred_element_type=jnp.float32)
         + b2.astype(jnp.float32).reshape(1, -1))
    return y.reshape(x.shape[0], 1, w2.shape[1])


if __name__ == "__main__":
    # Small shapes consistent with the module; input_size must equal hidden_size
    # for the reference forward (fc1 applied directly to x) to be well-formed.
    seq = 8
    input_size = hidden_size = 32
    num_classes = 8

    key = jax.random.PRNGKey(0)
    kx, kp = jax.random.split(key)
    x = jax.random.normal(kx, (seq, input_size), jnp.float32)

    w1, b1, w2, b2 = init_params(kp, input_size, hidden_size, num_classes)
    w1b, b1f, w2b, b2f = pack_params(w1, b1, w2, b2)   # once, outside the hot path

    out = feedforward_pallas(x, w1b, b1f, w2b, b2f)
    out = jax.block_until_ready(out)

    ref = feedforward_ref(x, w1, b1, w2, b2)
    assert out.shape == (seq, 1, num_classes), out.shape
    assert jnp.allclose(out, ref, atol=1e-2, rtol=1e-2), "mismatch vs reference"

    print("KERNEL_OK")
</pallas_src>

<mosaic_0001>
module attributes {stable_mosaic.version = 11 : i64} {
  func.func @ffn_kernel(%arg0: i32, %arg1: memref<8x32xf32, #tpu.memory_space<vmem>>, %arg2: memref<32x64xbf16, #tpu.memory_space<vmem>>, %arg3: memref<1x64xf32, #tpu.memory_space<vmem>>, %arg4: memref<64x8xbf16, #tpu.memory_space<vmem>>, %arg5: memref<1x8xf32, #tpu.memory_space<vmem>>, %arg6: memref<8x8xf32, #tpu.memory_space<vmem>>) attributes {dimension_semantics = [#tpu.dimension_semantics<parallel>], iteration_bounds = array<i64: 1>, scalar_prefetch = 0 : i64, scratch_operands = 0 : i64, tpu.core_type = #tpu.core_type<tc>, window_params = [{transform_indices = @transform_0, window_bounds = array<i64: 8, 32>}, {pipeline_mode = #tpu.pipeline_mode<synchronous>, transform_indices = @transform_1, window_bounds = array<i64: 32, 64>}, {pipeline_mode = #tpu.pipeline_mode<synchronous>, transform_indices = @transform_2, window_bounds = array<i64: 1, 64>}, {pipeline_mode = #tpu.pipeline_mode<synchronous>, transform_indices = @transform_3, window_bounds = array<i64: 64, 8>}, {pipeline_mode = #tpu.pipeline_mode<synchronous>, transform_indices = @transform_4, window_bounds = array<i64: 1, 8>}, {transform_indices = @transform_5, window_bounds = array<i64: 8, 8>}]} {
    %c0 = arith.constant 0 : index
    %c0_0 = arith.constant 0 : index
    %0 = vector.load %arg1[%c0, %c0_0] : memref<8x32xf32, #tpu.memory_space<vmem>>, vector<8x32xf32>
    %1 = arith.truncf %0 : vector<8x32xf32> to vector<8x32xbf16>
    %c0_1 = arith.constant 0 : index
    %c0_2 = arith.constant 0 : index
    %2 = vector.load %arg2[%c0_1, %c0_2] : memref<32x64xbf16, #tpu.memory_space<vmem>>, vector<32x64xbf16>
    %cst = arith.constant dense<0.000000e+00> : vector<8x64xf32>
    %3 = tpu.matmul %1, %2, %cst {dimension_numbers = #tpu.dot_dimension_numbers<[1], [0], [0], [1], [0, 0, 1, 1], [], []>} : vector<8x32xbf16>, vector<32x64xbf16>, vector<8x64xf32> -> vector<8x64xf32>
    %c0_3 = arith.constant 0 : index
    %c0_4 = arith.constant 0 : index
    %4 = vector.load %arg3[%c0_3, %c0_4] : memref<1x64xf32, #tpu.memory_space<vmem>>, vector<1x64xf32>
    %5 = vector.broadcast %4 : vector<1x64xf32> to vector<8x64xf32>
    %6 = arith.addf %3, %5 : vector<8x64xf32>
    %cst_5 = arith.constant 0.000000e+00 : f32
    %7 = vector.broadcast %cst_5 : f32 to vector<8x64xf32>
    %8 = arith.maximumf %6, %7 : vector<8x64xf32>
    %9 = arith.truncf %8 : vector<8x64xf32> to vector<8x64xbf16>
    %c0_6 = arith.constant 0 : index
    %c0_7 = arith.constant 0 : index
    %10 = vector.load %arg4[%c0_6, %c0_7] : memref<64x8xbf16, #tpu.memory_space<vmem>>, vector<64x8xbf16>
    %cst_8 = arith.constant dense<0.000000e+00> : vector<8x8xf32>
    %11 = tpu.matmul %9, %10, %cst_8 {dimension_numbers = #tpu.dot_dimension_numbers<[1], [0], [0], [1], [0, 0, 1, 1], [], []>} : vector<8x64xbf16>, vector<64x8xbf16>, vector<8x8xf32> -> vector<8x8xf32>
    %c0_9 = arith.constant 0 : index
    %c0_10 = arith.constant 0 : index
    %12 = vector.load %arg5[%c0_9, %c0_10] : memref<1x8xf32, #tpu.memory_space<vmem>>, vector<1x8xf32>
    %13 = vector.broadcast %12 : vector<1x8xf32> to vector<8x8xf32>
    %14 = arith.addf %11, %13 : vector<8x8xf32>
    %c0_11 = arith.constant 0 : index
    %c0_12 = arith.constant 0 : index
    %15 = vector.load %arg6[%c0_11, %c0_12] : memref<8x8xf32, #tpu.memory_space<vmem>>, vector<8x8xf32>
    tpu.vector_store %arg6[%c0_11, %c0_12], %14 {strides = array<i32>} : memref<8x8xf32, #tpu.memory_space<vmem>>, vector<8x8xf32>,
    return
  }
  func.func @transform_0(%arg0: i32) -> (i32, i32) {
    %c0_i32 = arith.constant 0 : i32
    %c0_i32_0 = arith.constant 0 : i32
    return %arg0, %c0_i32 : i32, i32
  }
  func.func @transform_1(%arg0: i32) -> (i32, i32) {
    %c0_i32 = arith.constant 0 : i32
    %c0_i32_0 = arith.constant 0 : i32
    %c0_i32_1 = arith.constant 0 : i32
    return %c0_i32, %c0_i32_0 : i32, i32
  }
  func.func @transform_2(%arg0: i32) -> (i32, i32) {
    %c0_i32 = arith.constant 0 : i32
    %c0_i32_0 = arith.constant 0 : i32
    %c0_i32_1 = arith.constant 0 : i32
    return %c0_i32, %c0_i32_0 : i32, i32
  }
  func.func @transform_3(%arg0: i32) -> (i32, i32) {
    %c0_i32 = arith.constant 0 : i32
    %c0_i32_0 = arith.constant 0 : i32
    %c0_i32_1 = arith.constant 0 : i32
    return %c0_i32, %c0_i32_0 : i32, i32
  }
  func.func @transform_4(%arg0: i32) -> (i32, i32) {
    %c0_i32 = arith.constant 0 : i32
    %c0_i32_0 = arith.constant 0 : i32
    %c0_i32_1 = arith.constant 0 : i32
    return %c0_i32, %c0_i32_0 : i32, i32
  }
  func.func @transform_5(%arg0: i32) -> (i32, i32) {
    %c0_i32 = arith.constant 0 : i32
    %c0_i32_0 = arith.constant 0 : i32
    return %arg0, %c0_i32 : i32, i32
  }
}

</mosaic_0001>

<bundles_post_ra>
// kernel: feedforward_pallas.1
= control target key start
LH: loop header
LB: loop body
LE: loop exit
PB: predicated region body
PF: predicated region fallthrough
CT: control target
= control target key end

     0   :  { %v261_v1 = vmov 0.0   ;;  %vm262_vm0 = vmmov 0   ;;  %vm47_vm1 = vcmask 261120   ;;  %s324_s0 = inlined_call_operand.vmem [shape: f32[8,32], index: 0, kind: input, shape index: {}]   ;;  %s325_s1 = inlined_call_operand.vmem [shape: bf16[32,64], index: 1, kind: input, shape index: {}]   ;;  %s326_s2 = inlined_call_operand.vmem [shape: f32[1,64], index: 2, kind: input, shape index: {}]   ;;  %s327_s3 = inlined_call_operand.vmem [shape: bf16[64,8], index: 3, kind: input, shape index: {}]   ;;  %s328_s4 = inlined_call_operand.vmem [shape: f32[1,8], index: 4, kind: input, shape index: {}]   ;;  %s329_s5 = inlined_call_operand.hbm [shape: f32[8,8], index: 5, kind: output, shape index: {}]  }
   0x1   :  { %v233_v0 = vld [vmem:[%s325_s1 + $0x8] sm:$0xff]   ;;  %210 = vmatprep.subr.bf16.mxu0 %v261_v1  ;;  %v234_v2 = vld [vmem:[%s325_s1] sm:$0xff]   ;;  %218 = vmatprep.subr.bf16.mxu1 %v261_v1  ;;  %v235_v4 = vld [vmem:[%s327_s3 + $0x18] sm:$0xff]  }
   0x2   :  { %211 = vmatpush3.bf16.msra.mxu0 %v233_v0  ;;  %214 = vmatprep.mubr.msk.bf16.mxu0 %vm262_vm0, %v261_v1  ;;  %v22_v3 = vld [vmem:[%s324_s0] sm:$0xff]  ;;  %v236_v5 = vld [vmem:[%s327_s3 + $0x10] sm:$0xff]  }
   0x3   :  { %212 = vmatprep.subr.bf16.mxu0 %v261_v1  ;;  %226 = vmatprep.mubr.msk.bf16.mxu1 %vm262_vm0, %v261_v1  ;;  %v23_v6 = vpack.c.bf16 %v22_v3, %v22_v3 }
   0x4   :  { %219 = vmatpush3.bf16.msra.mxu1 %v235_v4 }
   0x5   :  { %220 = vmatprep.subr.bf16.mxu1 %v261_v1 }
   0x6   :  { %213 = vmatpush3.bf16.msra.mxu0 %v234_v2 }
   0x7   :  { %10 = vsyncpa [#allocation3], 0  ;;  %v237_v7 = vld [vmem:[%s327_s3 + $0x8] sm:$0xff]   ;;  %v238_v8 = vld [vmem:[%s327_s3] sm:$0xff]   ;;  %vm132_vm2 = vcmask 523264   ;;  %s263_s9 = smov [#allocation2]  }
   0x8   :  { %221 = vmatpush3.bf16.msra.mxu1 %v236_v5  ;;  %v192_v9 = vld [vmem:[%s326_s2] ss:$0 sm:$0xff]  ;;  %s184_s3 = sshll.u32 %s263_s9, 4  ;;  %vm176_vm3 = vcmask 64512   ;;  %s185_s3 = int_to_ptr.vmem [resolvable:$true] %s184_s3 }
   0x9   :  { %215 = vmatmul.mubr.msk.bf16.vlgmr.msra.gmra.mxu0 %vm47_vm1, %v23_v6  ;;  %222 = vmatprep.subr.bf16.mxu1 %v261_v1  ;;  %v196_v17 = vld [vmem:[%s328_s4] ss:$0 sm:$0xff]  ;;  %s239_s2 = scalar_lea.vmem %s185_s3, 128  ;;  %p244_p1 = scmp.lt.s32.totalorder %s185_s3, %s185_s3 }
   0xa   :  { %p240_p0 = scmp.ne.s32.totalorder %s185_s3, %s239_s2  ;;  %p245_p2 = scmp.lt.s32.totalorder %s239_s2, %s239_s2 }
   0xc   :  { %223 = vmatpush3.bf16.msra.mxu1 %v237_v7  ;;  %p246_p3 = por %p245_p2, %p244_p1 }
   0xd   :  { %224 = vmatprep.subr.bf16.mxu1 %v261_v1 }
   0xe   :  { %p247_p4 = pnand %p246_p3, %p240_p0 }
  0x10   :  { %225 = vmatpush3.bf16.msra.mxu1 %v238_v8 }
  0xc9   :  { %v85_v10 = vpop.f32.mrf.mxu0 }
  0xca   :  { %v86_v11 = vadd.f32 %v192_v9, %v85_v10 }
  0xcb   :  { %v216_v12 = vpop.f32.mrf.mxu0 }
  0xcc   :  { %v91_v13 = vmax.f32 %v86_v11, 0.0 }
  0xcd   :  { %v88_v14 = vpop.f32.mrf.mxu0 }
  0xce   :  { %v92_v15 = vpack.c.bf16 %v91_v13, %v91_v13 }
  0xcf   :  { %v217_v16 = vpop.f32.mrf.mxu0 }
  0xd0   :  { %227 = vmatmul.mubr.msk.bf16.vlgmr.msra.gmra.mxu1 %vm132_vm2, %v92_v15 }
 0x190   :  { %v170_v18 = vpop.f32.mrf.mxu1 }
 0x191   :  { %v171_v19 = vadd.f32 %v196_v17, %v170_v18 }
 0x192   :  { %v228_v20 = vpop.f32.mrf.mxu1 }
 0x193   :  { %177 = vst.msk [vmem:[#allocation2] sm:$0xff] %vm176_vm3, %v171_v19 }
 0x194   :  { %v173_v21 = vpop.f32.mrf.mxu1 }
 0x195   :  { %250 = shalt.err (!%p247_p4)
}
 0x196   :  { %187 = dma.vmem_to_hbm [thread:$0]  %s185_s3, 128, %s329_s5, [#allocation3]   ;;  %v229_v22 = vpop.f32.mrf.mxu1 }
 0x197   :  { %259 = dma.done.wait [#allocation3], 128  }
 0x198   :  { %260 = vsyncadd [#allocation3], 4294967168 }
 0x199   :  { %191 = vsyncpa [#allocation3], 1 }

</bundles_post_ra>
